<compile_context>
chip_gen: v7x
topology: tpu7x:2x2x1
jax: 0.10.0
libtpu: 0.0.40
codegen_flags: <defaults>
</compile_context>

<pallas_src>
import functools

import jax
import jax.numpy as jnp
from jax.experimental import pallas as pl
from jax.experimental.pallas import tpu as pltpu

_K = 32.0

# Relative (dy, dx) target offsets implied by the (L, R, T, B) `shifts` tuple
# of the PyTorch module (target padded on the opposite side, cropped back).
# First entry = center; used by the pure-JAX reference.
_REL_SHIFTS = (
    (0, 0), (1, 0), (-1, 0), (0, 1), (0, -1), (1, 1), (-1, -1), (1, -1), (-1, 1),
)

# ---------------------------------------------------------------------------
# pltpu.roll convention probe
# ---------------------------------------------------------------------------
# The kernel pairs each lane roll with a boundary mask, so the roll direction
# convention matters.  Probe it once on-device so the shift/mask pairing is
# correct regardless of convention.
_ROLL_IS_JNP = None


def _roll_probe_kernel(x_ref, o_ref):
    o_ref[...] = pltpu.roll(x_ref[...], shift=1, axis=1)


def _roll_matches_jnp() -> bool:
    global _ROLL_IS_JNP
    if _ROLL_IS_JNP is None:
        probe_in = jnp.tile(jnp.arange(128, dtype=jnp.float32)[None, :], (8, 1))
        probe_out = pl.pallas_call(
            _roll_probe_kernel,
            out_shape=jax.ShapeDtypeStruct((8, 128), jnp.float32),
        )(probe_in)
        # jnp.roll convention: out[0] = in[-1] = 127.
        _ROLL_IS_JNP = bool(float(jax.device_get(probe_out)[0, 0]) == 127.0)
    return _ROLL_IS_JNP


# ---------------------------------------------------------------------------
# Kernel
# ---------------------------------------------------------------------------
def _make_jitter_kernel(tb, ml, d, roll_is_jnp):
    def kernel(x_ref, tpad_ref, out_ref):
        # Cast in-kernel: x arrives f32, target arrives int32 (class ids).
        x = x_ref[...].astype(jnp.float32)        # (tb, ml, d)
        tp = tpad_ref[...].astype(jnp.float32)    # (tb, ml + 2, d), rows zero-padded

        def lane_shifted(dx):
            """tp shifted by dx along lanes with zero fill: Tz[:, :, j + dx]."""
            if dx == 0:
                return tp
            shift = (-dx) % d if roll_is_jnp else dx % d
            rolled = pltpu.roll(tp, shift=shift, axis=2)
            col = jax.lax.broadcasted_iota(jnp.int32, (tb, ml + 2, d), 2)
            valid = (col + dx >= 0) & (col + dx < d)
            return jnp.where(valid, rolled, 0.0)

        def shifted_diffs():
            # dx outer so each lane-rolled target is built once and reused for
            # the 3 row shifts; only one shifted target is live at a time.
            for dx in (0, 1, -1):
                t_dx = lane_shifted(dx)
                for dy in (0, 1, -1):
                    t_s = t_dx[:, 1 + dy:1 + dy + ml, :]      # (tb, ml, d)
                    yield jnp.abs(x - t_s), (dx == 0 and dy == 0)

        # Pass 1: center term + row-wise min over all 9*d diffs (exact
        # smooth-min stabilizer; mathematically a no-op, prevents -log(0)).
        dmin = None
        center = None
        for diff, is_center in shifted_diffs():
            dmin = diff if dmin is None else jnp.minimum(dmin, diff)
            if is_center:
                center = diff[:, :, 0]                         # (tb, ml)
        m = jnp.min(dmin, axis=-1, keepdims=True)              # (tb, ml, 1)

        # Pass 2: accumulate exp terms elementwise (VALU adds, EUP exps);
        # a single cross-lane reduction after the shift loop.
        acc = jnp.zeros((tb, ml, d), jnp.float32)
        for diff, _ in shifted_diffs():
            acc = acc + jnp.exp(-_K * (diff - m))
        s = jnp.sum(acc, axis=-1)                              # (tb, ml)
        smin = m[:, :, 0] - jnp.log(s) / _K
        out_ref[...] = 0.5 * (center + smin)                   # lane-dense store

    return kernel


def _pick_batch_tile(bsz, ml, d):
    """Batch tile: large enough to amortize per-grid-step overhead, bounded by
    a VMEM budget, and sublane-legal for the 2D (TB, max_len) output block
    (TB must be a multiple of 8 or equal to the full batch)."""
    budget_elems = (2 * 1024 * 1024) // 4          # ~2 MiB of f32 per input block
    cap = max(1, budget_elems // ((ml + 2) * d))
    if bsz <= cap:
        return bsz
    tb = 8 * (cap // 8)
    while tb >= 8:
        if bsz % tb == 0:
            return tb
        tb -= 8
    return bsz  # fallback: one big block (always legal; rarely reached)


@functools.partial(jax.jit, static_argnums=(2,))
def _jitter_forward_jit(x, target, roll_is_jnp):
    bsz, ml, d = x.shape
    tb = _pick_batch_tile(bsz, ml, d)
    # Zero-pad the target along max_len only; lanes stay D-aligned and the
    # dx shifts are realized in-kernel (no lane-misaligned windows).
    tpad = jnp.pad(target, ((0, 0), (1, 1), (0, 0)))
    kernel = _make_jitter_kernel(tb, ml, d, roll_is_jnp)
    return pl.pallas_call(
        kernel,
        out_shape=jax.ShapeDtypeStruct((bsz, ml), jnp.float32),
        grid=(bsz // tb,),
        in_specs=[
            pl.BlockSpec((tb, ml, d), lambda b: (b, 0, 0)),
            pl.BlockSpec((tb, ml + 2, d), lambda b: (b, 0, 0)),
        ],
        out_specs=pl.BlockSpec((tb, ml), lambda b: (b, 0)),
        compiler_params=pltpu.CompilerParams(
            dimension_semantics=("parallel",),
            vmem_limit_bytes=32 * 1024 * 1024,
        ),
    )(x, tpad)


def jitter_forward(x, target):
    """x: (batch, max_len, dim) float; target: (batch, max_len, dim) int class
    ids -> (batch, max_len) float32."""
    return _jitter_forward_jit(x, target, _roll_matches_jnp())


# ---------------------------------------------------------------------------
# Pure-JAX reference (direct, unstabilized translation of the same semantics)
# ---------------------------------------------------------------------------
def jitter_reference(x, target):
    x = x.astype(jnp.float32)
    t = target.astype(jnp.float32)
    bsz, ml, d = x.shape
    tpad = jnp.pad(t, ((0, 0), (1, 1), (1, 1)))
    diffs = []
    for dy, dx in _REL_SHIFTS:
        ts = jax.lax.slice(tpad, (0, 1 + dy, 1 + dx), (bsz, 1 + dy + ml, 1 + dx + d))
        diffs.append(jnp.abs(x - ts))
    cat = jnp.concatenate(diffs, axis=-1)                        # (B, ML, 9*D)
    smin = -jnp.log(jnp.sum(jnp.exp(-_K * cat), axis=-1)) / _K   # (B, ML)
    return 0.5 * (cat[:, :, 0] + smin)


if __name__ == "__main__":
    key = jax.random.PRNGKey(0)
    k1, k2 = jax.random.split(key)
    B, ML, D = 2, 8, 32
    x = jax.random.uniform(k1, (B, ML, D), dtype=jnp.float32)
    # Docstring says LongTensor of class indices; keep it integer-typed and
    # let the kernel cast.
    target = jax.random.randint(k2, (B, ML, D), 0, 2).astype(jnp.int32)

    out = jitter_forward(x, target)
    out = jax.block_until_ready(out)

    ref = jitter_reference(x, target)
    assert out.shape == (B, ML), out.shape
    assert jnp.allclose(out, ref, atol=1e-5, rtol=1e-5), (
        f"max abs err = {jnp.max(jnp.abs(out - ref))}"
    )
    print("KERNEL_OK")
</pallas_src>

<mosaic_0001>
module attributes {stable_mosaic.version = 11 : i64} {
  func.func @_roll_probe_kernel(%arg0: memref<8x128xf32, #tpu.memory_space<vmem>>, %arg1: memref<8x128xf32, #tpu.memory_space<vmem>>) attributes {dimension_semantics = [], scalar_prefetch = 0 : i64, scratch_operands = 0 : i64, tpu.core_type = #tpu.core_type<tc>} {
    %c0 = arith.constant 0 : index
    %c0_0 = arith.constant 0 : index
    %0 = vector.load %arg0[%c0, %c0_0] : memref<8x128xf32, #tpu.memory_space<vmem>>, vector<8x128xf32>
    %c1_i32 = arith.constant 1 : i32
    %1 = tpu.dynamic_rotate %0 by %c1_i32 dim 1 : vector<8x128xf32>, i32 -> vector<8x128xf32>
    %c0_1 = arith.constant 0 : index
    %c0_2 = arith.constant 0 : index
    %2 = vector.load %arg1[%c0_1, %c0_2] : memref<8x128xf32, #tpu.memory_space<vmem>>, vector<8x128xf32>
    tpu.vector_store %arg1[%c0_1, %c0_2], %1 {strides = array<i32>} : memref<8x128xf32, #tpu.memory_space<vmem>>, vector<8x128xf32>,
    return
  }
}

</mosaic_0001>

<bundles_post_ra>
// kernel: tpu_custom_call.1
= control target key start
LH: loop header
LB: loop body
LE: loop exit
PB: predicated region body
PF: predicated region fallthrough
CT: control target
= control target key end

     0   :  { %6 = vsyncpa [#allocation3], 0  ;;  %s128_s0 = inlined_call_operand.hbm [shape: f32[8,128], index: 0, kind: input, shape index: {}]   ;;  %s129_s1 = inlined_call_operand.hbm [shape: f32[8,128], index: 1, kind: output, shape index: {}]  }
   0x1   :  { %7 = vsyncpa [#allocation4], 0  ;;  %s91_s6 = smov [#allocation2]   ;;  %s43_s10 = scalar_lea.hbm %s128_s0, 128 }
   0x2   :  { %s14_s7 = sshll.u32 %s91_s6, 4  ;;  %p44_p0 = scmp.ne.s32.totalorder %s128_s0, %s43_s10  ;;  %s15_s7 = int_to_ptr.vmem [resolvable:$true] %s14_s7 }
   0x3   :  { %p47_p1 = scmp.lt.u32.totalorder %s43_s10, %s128_s0 }
   0x5   :  { %p49_p2 = pnand %p47_p1, %p44_p0 }
   0x7   :  { %52 = shalt.err (!%p49_p2)
}
   0x8   :  { %s53_s15 = scalar_lea.vmem %s15_s7, 128  ;;  %p58_p4 = scmp.lt.s32.totalorder %s15_s7, %s15_s7 }
   0x9   :  { %p54_p3 = scmp.ne.s32.totalorder %s15_s7, %s53_s15  ;;  %p59_p5 = scmp.lt.s32.totalorder %s53_s15, %s53_s15 }
   0xb   :  { %p60_p6 = por %p59_p5, %p58_p4 }
   0xd   :  { %p61_p7 = pnand %p60_p6, %p54_p3 }
   0xf   :  { %64 = shalt.err (!%p61_p7)
}
  0x10   :  { %17 = dma.hbm_to_vmem [thread:$0]  %s128_s0, 128, %s15_s7, [#allocation3]  }
  0x11   :  { %87 = dma.done.wait [#allocation3], 128  }
  0x12   :  { %88 = vsyncadd [#allocation3], 4294967168  ;;  %v21_v0 = vld [vmem:[#allocation2] sm:$0xff]  ;;  %s92_s18 = smov 1   ;;  %s93_s19 = smov [#allocation5]  }
  0x13   :  { %22 = vrot.lane.b32.xlu0 %v21_v0, %s92_s18  ;;  %s31_s20 = sshll.u32 %s93_s19, 4  ;;  %s32_s20 = int_to_ptr.vmem [resolvable:$true] %s31_s20 }
  0x14   :  { %s65_s21 = scalar_lea.vmem %s32_s20, 128  ;;  %p70_p9 = scmp.lt.s32.totalorder %s32_s20, %s32_s20 }
  0x15   :  { %p66_p8 = scmp.ne.s32.totalorder %s32_s20, %s65_s21  ;;  %p71_p10 = scmp.lt.s32.totalorder %s65_s21, %s65_s21 }
  0x17   :  { %p72_p11 = por %p71_p10, %p70_p9 }
  0x19   :  { %p73_p12 = pnand %p72_p11, %p66_p8 }
  0x85   :  { %v23_v1 = vpop.permute.xlu0 %22 }
  0x86   :  { %24 = vst [vmem:[#allocation5] sm:$0xff] %v23_v1 }
  0x87   :  { %76 = shalt.err (!%p73_p12)
}
  0x88   :  { %s77_s0 = scalar_lea.hbm %s129_s1, 128 }
  0x89   :  { %p78_p13 = scmp.ne.s32.totalorder %s129_s1, %s77_s0  ;;  %p81_p0 = scmp.lt.u32.totalorder %s77_s0, %s129_s1 }
  0x8b   :  { %p83_p1 = pnand %p81_p0, %p78_p13 }
  0x8d   :  { %86 = shalt.err (!%p83_p1)
}
  0x8e   :  { %34 = dma.vmem_to_hbm [thread:$0]  %s32_s20, 128, %s129_s1, [#allocation4]  }
  0x8f   :  { %89 = dma.done.wait [#allocation4], 128  }
  0x90   :  { %90 = vsyncadd [#allocation4], 4294967168 }
  0x91   :  { %38 = vsyncpa [#allocation3], 1 }
  0x92   :  { %39 = vsyncpa [#allocation4], 1 }

</bundles_post_ra>
